<compile_context>
chip_gen: v6e
topology: v6e:2x2x1
jax: 0.10.0
libtpu: 0.0.40
codegen_flags: <defaults>
</compile_context>

<pallas_src>
import math
import jax
import jax.numpy as jnp
from jax.experimental import pallas as pl
from jax.experimental.pallas import tpu as pltpu

BN_EPS = 1e-5
H1, H2 = 500, 300            # logical hidden sizes (PyTorch spec)
H1_PAD, H2_PAD = 512, 384    # lane-padded hidden sizes (multiples of 128)


def _round_up(n, m):
    return ((n + m - 1) // m) * m


def _mlp_body(xn, w1_ref, b1_ref, w2_ref, b2_ref, w3_ref, b3_ref, out_ref):
    """Shared 3-layer MLP: bf16 MXU operands, f32 accumulate, f32 elementwise."""
    h1 = jnp.dot(xn.astype(jnp.bfloat16), w1_ref[...],
                 preferred_element_type=jnp.float32) + b1_ref[...]
    h1 = jnp.maximum(h1, 0.0)

    h2 = jnp.dot(h1.astype(jnp.bfloat16), w2_ref[...],
                 preferred_element_type=jnp.float32) + b2_ref[...]
    h2 = jnp.maximum(h2, 0.0)

    o = jnp.dot(h2.astype(jnp.bfloat16), w3_ref[...],
                preferred_element_type=jnp.float32) + b3_ref[...]
    out_ref[...] = jnp.tanh(o)


# ---------------------------------------------------------------------------
# Gridless kernel: whole batch + weights live in VMEM, BN stats in-kernel.
# ---------------------------------------------------------------------------
def actor_kernel(x_ref, gamma_ref, beta_ref,
                 w1_ref, b1_ref, w2_ref, b2_ref, w3_ref, b3_ref,
                 out_ref):
    x = x_ref[...]                                              # [B, S_pad] f32
    # BatchNorm1d (training-mode biased batch stats), folded scale/shift.
    mean = jnp.mean(x, axis=0, keepdims=True)
    centered = x - mean
    var = jnp.mean(centered * centered, axis=0, keepdims=True)
    scale = gamma_ref[...] * jax.lax.rsqrt(var + BN_EPS)        # pad cols -> 0
    xn = centered * scale + beta_ref[...]
    _mlp_body(xn, w1_ref, b1_ref, w2_ref, b2_ref, w3_ref, b3_ref, out_ref)


# ---------------------------------------------------------------------------
# Batch-tiled kernel: BN already folded to scale/shift outside (full-batch
# stats); weights stay VMEM-resident across batch tiles.
# ---------------------------------------------------------------------------
def actor_kernel_tiled(scale_ref, shift_ref, x_ref,
                       w1_ref, b1_ref, w2_ref, b2_ref, w3_ref, b3_ref,
                       out_ref):
    xn = x_ref[...] * scale_ref[...] + shift_ref[...]
    _mlp_body(xn, w1_ref, b1_ref, w2_ref, b2_ref, w3_ref, b3_ref, out_ref)


def _cost(args, B, s_pad, a_pad, n_transc):
    flops = 2 * B * (s_pad * H1_PAD + H1_PAD * H2_PAD + H2_PAD * a_pad)
    bytes_accessed = (sum(int(a.size) * a.dtype.itemsize for a in args)
                      + B * a_pad * 4)
    return pl.CostEstimate(flops=flops, transcendentals=n_transc,
                           bytes_accessed=bytes_accessed)


def _actor_forward_gridless(x_pad, params):
    B, s_pad = x_pad.shape
    a_pad = params["w3"].shape[1]
    args = (x_pad, params["bn_gamma"], params["bn_beta"],
            params["w1"], params["b1"],
            params["w2"], params["b2"],
            params["w3"], params["b3"])
    vmem = pl.BlockSpec(memory_space=pltpu.MemorySpace.VMEM)
    return pl.pallas_call(
        actor_kernel,
        out_shape=jax.ShapeDtypeStruct((B, a_pad), jnp.float32),
        in_specs=[vmem] * len(args),
        out_specs=vmem,
        cost_estimate=_cost(args, B, s_pad, a_pad, B * a_pad + s_pad),
    )(*args)


def _actor_forward_tiled(x_pad, params, batch_tile):
    B, s_pad = x_pad.shape
    a_pad = params["w3"].shape[1]
    assert B % batch_tile == 0 and batch_tile % 8 == 0

    # Training-mode BN statistics must span the FULL batch, so compute them
    # once outside the kernel (tiny XLA reduction) and fold to scale/shift.
    mean = jnp.mean(x_pad, axis=0, keepdims=True)
    var = jnp.mean((x_pad - mean) ** 2, axis=0, keepdims=True)
    scale = params["bn_gamma"] * jax.lax.rsqrt(var + BN_EPS)    # pad cols -> 0
    shift = params["bn_beta"] - mean * scale

    args = (scale, shift, x_pad,
            params["w1"], params["b1"],
            params["w2"], params["b2"],
            params["w3"], params["b3"])

    def resident(shape):
        # Same block every grid step -> stays VMEM-resident (no re-fetch).
        return pl.BlockSpec(shape, lambda i: (0, 0))

    grid_spec = pltpu.PrefetchScalarGridSpec(
        num_scalar_prefetch=0,
        grid=(B // batch_tile,),
        in_specs=[
            resident((1, s_pad)),                                # scale
            resident((1, s_pad)),                                # shift
            pl.BlockSpec((batch_tile, s_pad), lambda i: (i, 0)),  # x tile
            resident((s_pad, H1_PAD)),                           # w1
            resident((1, H1_PAD)),                               # b1
            resident((H1_PAD, H2_PAD)),                          # w2
            resident((1, H2_PAD)),                               # b2
            resident((H2_PAD, a_pad)),                           # w3
            resident((1, a_pad)),                                # b3
        ],
        out_specs=pl.BlockSpec((batch_tile, a_pad), lambda i: (i, 0)),
    )

    return pl.pallas_call(
        actor_kernel_tiled,
        out_shape=jax.ShapeDtypeStruct((B, a_pad), jnp.float32),
        grid_spec=grid_spec,
        compiler_params=pltpu.CompilerParams(
            dimension_semantics=("parallel",)),
        cost_estimate=_cost(args, B, s_pad, a_pad, B * a_pad),
    )(*args)


def actor_forward(states, params, action_size, *, batch_tile=256,
                  slice_output=True):
    """states: [B, state_size] f32 -> actions [B, action_size] f32.

    Batches up to ~batch_tile run gridless (fastest: no per-step overhead);
    larger batches that divide batch_tile use the batch-tiled grid with
    VMEM-resident weights and a "parallel" batch axis.
    """
    B, S = states.shape
    s_pad = params["w1"].shape[0]
    a_pad = params["w3"].shape[1]

    x = states.astype(jnp.float32)
    if S != s_pad:
        # Lane-pad the state dim with exact zeros (could be fused upstream).
        x = jnp.pad(x, ((0, 0), (0, s_pad - S)))

    if B > batch_tile and B % batch_tile == 0:
        out_pad = _actor_forward_tiled(x, params, batch_tile)
    else:
        out_pad = _actor_forward_gridless(x, params)

    # Padded output columns are exactly tanh(0)=0.
    return out_pad[:, :action_size] if slice_output else out_pad


def init_actor_params(key, state_size, action_size):
    """Init mirroring Actor.__init__ / reset_parameters shapes.

    Torch Linear stores weight as [out, in]; we store the transpose [in, out],
    zero-padded to lane-friendly widths and cast to bf16.
    hidden_init uses 1/sqrt(weight.size(0)) = 1/sqrt(out_features).
    """
    s_pad = _round_up(state_size, 128)
    a_pad = _round_up(action_size, 128)
    k1, k2, k3, kb1, kb2, kb3 = jax.random.split(key, 6)

    lim1 = 1.0 / math.sqrt(float(H1))       # hidden_init(self.input)
    lim2 = 1.0 / math.sqrt(float(H2))       # hidden_init(self.hidden1)
    lim3 = 0.003                            # output layer
    # Torch default bias init: uniform(-1/sqrt(in_features), 1/sqrt(in_features))
    blim1 = 1.0 / math.sqrt(float(state_size))
    blim2 = 1.0 / math.sqrt(float(H1))
    blim3 = 1.0 / math.sqrt(float(H2))

    u = lambda k, shape, lim: jax.random.uniform(
        k, shape, jnp.float32, minval=-lim, maxval=lim)

    w1 = u(k1, (state_size, H1), lim1)
    w2 = u(k2, (H1, H2), lim2)
    w3 = u(k3, (H2, action_size), lim3)
    b1 = u(kb1, (1, H1), blim1)
    b2 = u(kb2, (1, H2), blim2)
    b3 = u(kb3, (1, action_size), blim3)

    def pad2(a, rows, cols):
        out = jnp.zeros((rows, cols), a.dtype)
        return out.at[:a.shape[0], :a.shape[1]].set(a)

    return {
        # Pad entries of gamma/beta are exactly 0 -> padded BN columns stay 0.
        "bn_gamma": pad2(jnp.ones((1, state_size), jnp.float32), 1, s_pad),
        "bn_beta": jnp.zeros((1, s_pad), jnp.float32),
        # bf16 weights (halved DMA); pad region is exactly zero.
        "w1": pad2(w1, s_pad, H1_PAD).astype(jnp.bfloat16),
        "w2": pad2(w2, H1_PAD, H2_PAD).astype(jnp.bfloat16),
        "w3": pad2(w3, H2_PAD, a_pad).astype(jnp.bfloat16),
        # biases kept in f32 (added after the f32 accumulate).
        "b1": pad2(b1, 1, H1_PAD),
        "b2": pad2(b2, 1, H2_PAD),
        "b3": pad2(b3, 1, a_pad),
    }


def actor_forward_ref(states, p, action_size):
    """Pure-JAX reference on UNPADDED logical shapes (weights de-quantized
    from the same bf16 storage, so only the in-kernel activation casts differ)."""
    B, S = states.shape
    x = states.astype(jnp.float32)
    mean = jnp.mean(x, axis=0, keepdims=True)
    var = jnp.mean((x - mean) ** 2, axis=0, keepdims=True)
    x = ((x - mean) / jnp.sqrt(var + BN_EPS)
         * p["bn_gamma"][:, :S] + p["bn_beta"][:, :S])

    w1 = p["w1"][:S, :H1].astype(jnp.float32)
    w2 = p["w2"][:H1, :H2].astype(jnp.float32)
    w3 = p["w3"][:H2, :action_size].astype(jnp.float32)
    b1 = p["b1"][:, :H1]
    b2 = p["b2"][:, :H2]
    b3 = p["b3"][:, :action_size]

    x = jnp.maximum(x @ w1 + b1, 0.0)
    x = jnp.maximum(x @ w2 + b2, 0.0)
    return jnp.tanh(x @ w3 + b3)


if __name__ == "__main__":
    key = jax.random.PRNGKey(0)
    k_param, k_state, k_state_big = jax.random.split(key, 3)

    state_size = 32
    action_size = 4
    params = init_actor_params(k_param, state_size, action_size)

    # ---- small batch: gridless path (batch = multiple of 16 for bf16 packing)
    batch = 16
    states = jax.random.normal(k_state, (batch, state_size), jnp.float32)
    out = jax.block_until_ready(actor_forward(states, params, action_size))
    ref = actor_forward_ref(states, params, action_size)
    assert out.shape == (batch, action_size)
    assert jnp.allclose(out, ref, atol=1e-2, rtol=1e-2), "gridless mismatch"

    # ---- larger batch: batch-tiled path (weights VMEM-resident, parallel axis)
    big_batch = 128
    states_big = jax.random.normal(k_state_big, (big_batch, state_size),
                                   jnp.float32)
    out_big = jax.block_until_ready(
        actor_forward(states_big, params, action_size, batch_tile=64))
    ref_big = actor_forward_ref(states_big, params, action_size)
    assert out_big.shape == (big_batch, action_size)
    assert jnp.allclose(out_big, ref_big, atol=1e-2, rtol=1e-2), "tiled mismatch"

    print("KERNEL_OK")
</pallas_src>

<mosaic_0001>
module attributes {stable_mosaic.version = 11 : i64} {
  func.func @actor_kernel(%arg0: memref<16x128xf32, #tpu.memory_space<vmem>>, %arg1: memref<1x128xf32, #tpu.memory_space<vmem>>, %arg2: memref<1x128xf32, #tpu.memory_space<vmem>>, %arg3: memref<128x512xbf16, #tpu.memory_space<vmem>>, %arg4: memref<1x512xf32, #tpu.memory_space<vmem>>, %arg5: memref<512x384xbf16, #tpu.memory_space<vmem>>, %arg6: memref<1x384xf32, #tpu.memory_space<vmem>>, %arg7: memref<384x128xbf16, #tpu.memory_space<vmem>>, %arg8: memref<1x128xf32, #tpu.memory_space<vmem>>, %arg9: memref<16x128xf32, #tpu.memory_space<vmem>>) attributes {dimension_semantics = [], scalar_prefetch = 0 : i64, scratch_operands = 0 : i64, tpu.core_type = #tpu.core_type<tc>} {
    %c0 = arith.constant 0 : index
    %c0_0 = arith.constant 0 : index
    %0 = vector.load %arg0[%c0, %c0_0] : memref<16x128xf32, #tpu.memory_space<vmem>>, vector<16x128xf32>
    %cst = arith.constant dense<0.000000e+00> : vector<128xf32>
    %1 = vector.multi_reduction <add>, %0, %cst [0] : vector<16x128xf32> to vector<128xf32>
    %2 = vector.shape_cast %1 : vector<128xf32> to vector<1x128xf32>
    %cst_1 = arith.constant 1.600000e+01 : f32
    %3 = vector.broadcast %cst_1 : f32 to vector<1x128xf32>
    %4 = arith.divf %2, %3 : vector<1x128xf32>
    %5 = vector.broadcast %4 : vector<1x128xf32> to vector<16x128xf32>
    %6 = arith.subf %0, %5 : vector<16x128xf32>
    %7 = arith.mulf %6, %6 : vector<16x128xf32>
    %cst_2 = arith.constant dense<0.000000e+00> : vector<128xf32>
    %8 = vector.multi_reduction <add>, %7, %cst_2 [0] : vector<16x128xf32> to vector<128xf32>
    %9 = vector.shape_cast %8 : vector<128xf32> to vector<1x128xf32>
    %cst_3 = arith.constant 1.600000e+01 : f32
    %10 = vector.broadcast %cst_3 : f32 to vector<1x128xf32>
    %11 = arith.divf %9, %10 : vector<1x128xf32>
    %c0_4 = arith.constant 0 : index
    %c0_5 = arith.constant 0 : index
    %12 = vector.load %arg1[%c0_4, %c0_5] : memref<1x128xf32, #tpu.memory_space<vmem>>, vector<1x128xf32>
    %cst_6 = arith.constant 9.99999974E-6 : f32
    %13 = vector.broadcast %cst_6 : f32 to vector<1x128xf32>
    %14 = arith.addf %11, %13 : vector<1x128xf32>
    %15 = math.rsqrt %14 : vector<1x128xf32>
    %16 = arith.mulf %12, %15 : vector<1x128xf32>
    %17 = vector.broadcast %16 : vector<1x128xf32> to vector<16x128xf32>
    %18 = arith.mulf %6, %17 : vector<16x128xf32>
    %c0_7 = arith.constant 0 : index
    %c0_8 = arith.constant 0 : index
    %19 = vector.load %arg2[%c0_7, %c0_8] : memref<1x128xf32, #tpu.memory_space<vmem>>, vector<1x128xf32>
    %20 = vector.broadcast %19 : vector<1x128xf32> to vector<16x128xf32>
    %21 = arith.addf %18, %20 : vector<16x128xf32>
    %22 = arith.truncf %21 : vector<16x128xf32> to vector<16x128xbf16>
    %c0_9 = arith.constant 0 : index
    %c0_10 = arith.constant 0 : index
    %23 = vector.load %arg3[%c0_9, %c0_10] : memref<128x512xbf16, #tpu.memory_space<vmem>>, vector<128x512xbf16>
    %cst_11 = arith.constant dense<0.000000e+00> : vector<16x512xf32>
    %24 = tpu.matmul %22, %23, %cst_11 {dimension_numbers = #tpu.dot_dimension_numbers<[1], [0], [0], [1], [0, 0, 1, 1], [], []>} : vector<16x128xbf16>, vector<128x512xbf16>, vector<16x512xf32> -> vector<16x512xf32>
    %c0_12 = arith.constant 0 : index
    %c0_13 = arith.constant 0 : index
    %25 = vector.load %arg4[%c0_12, %c0_13] : memref<1x512xf32, #tpu.memory_space<vmem>>, vector<1x512xf32>
    %26 = vector.broadcast %25 : vector<1x512xf32> to vector<16x512xf32>
    %27 = arith.addf %24, %26 : vector<16x512xf32>
    %cst_14 = arith.constant 0.000000e+00 : f32
    %28 = vector.broadcast %cst_14 : f32 to vector<16x512xf32>
    %29 = arith.maximumf %27, %28 : vector<16x512xf32>
    %30 = arith.truncf %29 : vector<16x512xf32> to vector<16x512xbf16>
    %c0_15 = arith.constant 0 : index
    %c0_16 = arith.constant 0 : index
    %31 = vector.load %arg5[%c0_15, %c0_16] : memref<512x384xbf16, #tpu.memory_space<vmem>>, vector<512x384xbf16>
    %cst_17 = arith.constant dense<0.000000e+00> : vector<16x384xf32>
    %32 = tpu.matmul %30, %31, %cst_17 {dimension_numbers = #tpu.dot_dimension_numbers<[1], [0], [0], [1], [0, 0, 1, 1], [], []>} : vector<16x512xbf16>, vector<512x384xbf16>, vector<16x384xf32> -> vector<16x384xf32>
    %c0_18 = arith.constant 0 : index
    %c0_19 = arith.constant 0 : index
    %33 = vector.load %arg6[%c0_18, %c0_19] : memref<1x384xf32, #tpu.memory_space<vmem>>, vector<1x384xf32>
    %34 = vector.broadcast %33 : vector<1x384xf32> to vector<16x384xf32>
    %35 = arith.addf %32, %34 : vector<16x384xf32>
    %cst_20 = arith.constant 0.000000e+00 : f32
    %36 = vector.broadcast %cst_20 : f32 to vector<16x384xf32>
    %37 = arith.maximumf %35, %36 : vector<16x384xf32>
    %38 = arith.truncf %37 : vector<16x384xf32> to vector<16x384xbf16>
    %c0_21 = arith.constant 0 : index
    %c0_22 = arith.constant 0 : index
    %39 = vector.load %arg7[%c0_21, %c0_22] : memref<384x128xbf16, #tpu.memory_space<vmem>>, vector<384x128xbf16>
    %cst_23 = arith.constant dense<0.000000e+00> : vector<16x128xf32>
    %40 = tpu.matmul %38, %39, %cst_23 {dimension_numbers = #tpu.dot_dimension_numbers<[1], [0], [0], [1], [0, 0, 1, 1], [], []>} : vector<16x384xbf16>, vector<384x128xbf16>, vector<16x128xf32> -> vector<16x128xf32>
    %c0_24 = arith.constant 0 : index
    %c0_25 = arith.constant 0 : index
    %41 = vector.load %arg8[%c0_24, %c0_25] : memref<1x128xf32, #tpu.memory_space<vmem>>, vector<1x128xf32>
    %42 = vector.broadcast %41 : vector<1x128xf32> to vector<16x128xf32>
    %43 = arith.addf %40, %42 : vector<16x128xf32>
    %44 = math.tanh %43 : vector<16x128xf32>
    %c0_26 = arith.constant 0 : index
    %c0_27 = arith.constant 0 : index
    %45 = vector.load %arg9[%c0_26, %c0_27] : memref<16x128xf32, #tpu.memory_space<vmem>>, vector<16x128xf32>
    tpu.vector_store %arg9[%c0_26, %c0_27], %44 {strides = array<i32>} : memref<16x128xf32, #tpu.memory_space<vmem>>, vector<16x128xf32>,
    return
  }
}

</mosaic_0001>

<bundles_post_ra>
// kernel: tpu_custom_call.1
= control target key start
LH: loop header
LB: loop body
LE: loop exit
PB: predicated region body
PF: predicated region fallthrough
CT: control target
= control target key end

     0   :  { %14 = vsyncpa [#allocation3], 0  ;;  %s2362_s0 = inlined_call_operand.hbm [shape: f32[16,128], index: 0, kind: input, shape index: {}]   ;;  %s2363_s1 = inlined_call_operand.hbm [shape: f32[1,128], index: 1, kind: input, shape index: {}]   ;;  %s2364_s2 = inlined_call_operand.hbm [shape: f32[1,128], index: 2, kind: input, shape index: {}]   ;;  %s2365_s3 = inlined_call_operand.hbm [shape: bf16[128,512], index: 3, kind: input, shape index: {}]   ;;  %s2366_s4 = inlined_call_operand.vmem [shape: f32[1,512], index: 4, kind: input, shape index: {}]   ;;  %s2367_s5 = inlined_call_operand.hbm [shape: bf16[512,384], index: 5, kind: input, shape index: {}]   ;;  %s2368_s6 = inlined_call_operand.vmem [shape: f32[1,384], index: 6, kind: input, shape index: {}]   ;;  %s2369_s7 = inlined_call_operand.hbm [shape: bf16[384,128], index: 7, kind: input, shape index: {}]   ;;  %s2370_s8 = inlined_call_operand.vmem [shape: f32[1,128], index: 8, kind: input, shape index: {}]   ;;  %s2371_s9 = inlined_call_operand.hbm [shape: f32[16,128], index: 9, kind: output, shape index: {}]  }
   0x1   :  { %15 = vsyncpa [#allocation6], 0 }
   0x2   :  { %16 = vsyncpa [#allocation9], 0 }
   0x3   :  { %17 = vsyncpa [#allocation12], 0 }
   0x4   :  { %18 = vsyncpa [#allocation4], 0  ;;  %s2231_s30 = smov [#allocation5]   ;;  %s2232_s11 = smov [#allocation8]  }
   0x5   :  { %s37_s10 = sshll.u32 %s2231_s30, 4  ;;  %s56_s12 = sshll.u32 %s2232_s11, 4  ;;  %s38_s10 = int_to_ptr.vmem [resolvable:$true] %s37_s10  ;;  %s57_s12 = int_to_ptr.vmem [resolvable:$true] %s56_s12 }
   0x6   :  { %s2089_s13 = scalar_lea.vmem %s38_s10, 16  ;;  %s2093_s14 = scalar_lea.vmem %s38_s10, 32 }
   0x7   :  { %p2090_p0 = scmp.ne.s32.totalorder %s38_s10, %s2089_s13  ;;  %p2094_p1 = scmp.lt.s32.totalorder %s38_s10, %s38_s10 }
   0x8   :  { %p2095_p2 = scmp.lt.s32.totalorder %s2093_s14, %s2089_s13 }
   0xa   :  { %p2096_p3 = por %p2095_p2, %p2094_p1 }
   0xc   :  { %p2097_p4 = pnand %p2096_p3, %p2090_p0 }
   0xe   :  { %2100 = shalt.err (!%p2097_p4)
}
   0xf   :  { %40 = dma.hbm_to_vmem [thread:$0]  %s2363_s1, 16, %s38_s10, [#allocation6]  }
  0x10   :  { %s2109_s17 = scalar_lea.vmem %s57_s12, 4096  ;;  %p2114_p6 = scmp.lt.s32.totalorder %s57_s12, %s57_s12 }
  0x11   :  { %p2110_p5 = scmp.ne.s32.totalorder %s57_s12, %s2109_s17  ;;  %p2115_p7 = scmp.lt.s32.totalorder %s2109_s17, %s2109_s17 }
  0x13   :  { %p2116_p8 = por %p2115_p7, %p2114_p6 }
  0x15   :  { %p2117_p9 = pnand %p2116_p8, %p2110_p5 }
  0x17   :  { %2120 = shalt.err (!%p2117_p9)
}
  0x18   :  { %s2233_s18 = smov 256   ;;  %s2234_s19 = smov 16  }
  0x19   :  { %62 = dma.hbm_to_vmem [thread:$0]  %s2365_s3, 4096, %s57_s12, [#allocation9], %s2233_s18, %s2233_s18, %s2234_s19  }
  0x1a   :  { %s2235_s22 = smov [#allocation2]  }
  0x1b   :  { %s24_s23 = sshll.u32 %s2235_s22, 4  ;;  %s25_s23 = int_to_ptr.vmem [resolvable:$true] %s24_s23 }
  0x1c   :  { %s2129_s24 = scalar_lea.vmem %s25_s23, 256  ;;  %p2134_p11 = scmp.lt.s32.totalorder %s25_s23, %s25_s23 }
  0x1d   :  { %p2130_p10 = scmp.ne.s32.totalorder %s25_s23, %s2129_s24  ;;  %p2135_p12 = scmp.lt.s32.totalorder %s2129_s24, %s2129_s24 }
  0x1f   :  { %p2136_p13 = por %p2135_p12, %p2134_p11 }
  0x21   :  { %p2137_p0 = pnand %p2136_p13, %p2130_p10 }
  0x23   :  { %2140 = shalt.err (!%p2137_p0)
}
  0x24   :  { %s2236_s1 = smov 128   ;;  %s2237_s25 = smov 8  }
  0x25   :  { %30 = dma.hbm_to_vmem [thread:$0]  %s2362_s0, 256, %s25_s23, [#allocation3], %s2236_s1, %s2236_s1, %s2237_s25  }
  0x26   :  { %s2238_s3 = smov [#allocation7]   ;;  %s2239_s29 = smov [#allocation10]  }
  0x27   :  { %s47_s28 = sshll.u32 %s2238_s3, 4  ;;  %s70_s30 = sshll.u32 %s2239_s29, 4  ;;  %s48_s28 = int_to_ptr.vmem [resolvable:$true] %s47_s28  ;;  %s71_s30 = int_to_ptr.vmem [resolvable:$true] %s70_s30 }
  0x28   :  { %s2149_s10 = scalar_lea.vmem %s48_s28, 16  ;;  %s2153_s11 = scalar_lea.vmem %s48_s28, 32 }
  0x29   :  { %p2150_p1 = scmp.ne.s32.totalorder %s48_s28, %s2149_s10  ;;  %p2154_p2 = scmp.lt.s32.totalorder %s48_s28, %s48_s28 }
  0x2a   :  { %p2155_p3 = scmp.lt.s32.totalorder %s2153_s11, %s2149_s10 }
  0x2c   :  { %p2156_p4 = por %p2155_p3, %p2154_p2 }
  0x2e   :  { %p2157_p5 = pnand %p2156_p4, %p2150_p1 }
  0x30   :  { %2160 = shalt.err (!%p2157_p5)
}
  0x31   :  { %50 = dma.hbm_to_vmem [thread:$0]  %s2364_s2, 16, %s48_s28, [#allocation6]  }
  0x32   :  { %s2169_s14 = scalar_lea.vmem %s71_s30, 12288  ;;  %p2174_p7 = scmp.lt.s32.totalorder %s71_s30, %s71_s30 }
  0x33   :  { %p2170_p6 = scmp.ne.s32.totalorder %s71_s30, %s2169_s14  ;;  %p2175_p8 = scmp.lt.s32.totalorder %s2169_s14, %s2169_s14 }
  0x35   :  { %p2176_p9 = por %p2175_p8, %p2174_p7 }
  0x37   :  { %p2177_p10 = pnand %p2176_p9, %p2170_p6 }
  0x39   :  { %2180 = shalt.err (!%p2177_p10)
}
  0x3a   :  { %s2240_s0 = smov 192   ;;  %s2241_s15 = smov 12  }
  0x3b   :  { %76 = dma.hbm_to_vmem [thread:$0]  %s2367_s5, 12288, %s71_s30, [#allocation9], %s2240_s0, %s2240_s0, %s2241_s15  }
  0x3c   :  { %s2242_s18 = smov [#allocation11]  }
  0x3d   :  { %s84_s19 = sshll.u32 %s2242_s18, 4  ;;  %s85_s19 = int_to_ptr.vmem [resolvable:$true] %s84_s19 }
  0x3e   :  { %s2189_s20 = scalar_lea.vmem %s85_s19, 3072  ;;  %p2194_p12 = scmp.lt.s32.totalorder %s85_s19, %s85_s19 }
  0x3f   :  { %p2190_p11 = scmp.ne.s32.totalorder %s85_s19, %s2189_s20  ;;  %p2195_p13 = scmp.lt.s32.totalorder %s2189_s20, %s2189_s20 }
  0x41   :  { %p2196_p0 = por %p2195_p13, %p2194_p12 }
  0x43   :  { %p2197_p1 = pnand %p2196_p0, %p2190_p11 }
  0x45   :  { %2200 = shalt.err (!%p2197_p1)
}
  0x46   :  { %s2243_s2 = smov 64   ;;  %s2244_s21 = smov 4  }
  0x47   :  { %90 = dma.hbm_to_vmem [thread:$0]  %s2369_s7, 3072, %s85_s19, [#allocation12], %s2243_s2, %s2243_s2, %s2244_s21  }
  0x48   :  { %2221 = dma.done.wait [#allocation3], 256  }
  0x49   :  { %2222 = vsyncadd [#allocation3], 4294967040 }
  0x4a   :  { %2223 = dma.done.wait [#allocation6], 32  }
  0x4b   :  { %2224 = vsyncadd [#allocation6], 4294967264 }
  0x4c   :  { %2225 = dma.done.wait [#allocation9], 16384  }
  0x4d   :  { %2226 = vsyncadd [#allocation9], 4294950912 }
  0x4e   :  { %2227 = dma.done.wait [#allocation12], 3072  }
  0x4f   :  { %2228 = vsyncadd [#allocation12], 4294964224  ;;  %v2245_v0 = vmov 0   ;;  %v1875_v1 = vld [vmem:[#allocation8 + $0xe4] ss:$16 sps:$4 sm:$0xff]   ;;  %v112_v27 = vld [vmem:[#allocation2] sm:$0xff]  ;;  %v140_v55 = vlaneseq }
  0x50   :  { %403 = vmatprep.mubr.bf16.mxu0 %v2245_v0  ;;  %446 = vmatprep.mubr.bf16.mxu1 %v2245_v0  ;;  %v1877_v2 = vld [vmem:[#allocation8 + $0xec] ss:$16 sps:$4 sm:$0xff]   ;;  %v1879_v3 = vld [vmem:[#allocation8 + $0xe0] ss:$16 sps:$4 sm:$0xff]   ;;  %v1880_v4 = vld [vmem:[#allocation8 + $0xe8] ss:$16 sps:$4 sm:$0xff]  }
  0x51   :  { %371 = vmatprep.subr.bf16.mxu0 %v1875_v1  ;;  %414 = vmatprep.subr.bf16.mxu1 %v1877_v2  ;;  %v1881_v5 = vld [vmem:[#allocation8 + $0xc4] ss:$16 sps:$4 sm:$0xff]   ;;  %v1883_v6 = vld [vmem:[#allocation8 + $0xcc] ss:$16 sps:$4 sm:$0xff]   ;;  %v1885_v7 = vld [vmem:[#allocation8 + $0xc0] ss:$16 sps:$4 sm:$0xff]  }
  0x52   :  { %372 = vmatpush1.bf16.msra.mxu0 %v1879_v3  ;;  %415 = vmatpush1.bf16.msra.mxu1 %v1880_v4  ;;  %v1886_v8 = vld [vmem:[#allocation8 + $0xc8] ss:$16 sps:$4 sm:$0xff]   ;;  %v1887_v9 = vld [vmem:[#allocation8 + $0xa4] ss:$16 sps:$4 sm:$0xff]   ;;  %v1889_v10 = vld [vmem:[#allocation8 + $0xac] ss:$16 sps:$4 sm:$0xff]  }
  0x53   :  { %373 = vmatprep.subr.bf16.mxu0 %v1881_v5  ;;  %416 = vmatprep.subr.bf16.mxu1 %v1883_v6  ;;  %v1891_v11 = vld [vmem:[#allocation8 + $0xa0] ss:$16 sps:$4 sm:$0xff]   ;;  %v1892_v12 = vld [vmem:[#allocation8 + $0xa8] ss:$16 sps:$4 sm:$0xff]   ;;  %v1893_v13 = vld [vmem:[#allocation8 + $0x84] ss:$16 sps:$4 sm:$0xff]  }
  0x54   :  { %v1895_v14 = vld [vmem:[#allocation8 + $0x8c] ss:$16 sps:$4 sm:$0xff]   ;;  %v1897_v15 = vld [vmem:[#allocation8 + $0x80] ss:$16 sps:$4 sm:$0xff]   ;;  %v1898_v16 = vld [vmem:[#allocation8 + $0x88] ss:$16 sps:$4 sm:$0xff]  }
  0x55   :  { %v1899_v17 = vld [vmem:[#allocation8 + $0x64] ss:$16 sps:$4 sm:$0xff]   ;;  %v1901_v18 = vld [vmem:[#allocation8 + $0x6c] ss:$16 sps:$4 sm:$0xff]   ;;  %v1903_v19 = vld [vmem:[#allocation8 + $0x60] ss:$16 sps:$4 sm:$0xff]  }
  0x56   :  { %374 = vmatpush1.bf16.msra.mxu0 %v1885_v7  ;;  %417 = vmatpush1.bf16.msra.mxu1 %v1886_v8  ;;  %v1904_v20 = vld [vmem:[#allocation8 + $0x68] ss:$16 sps:$4 sm:$0xff]   ;;  %v1905_v21 = vld [vmem:[#allocation8 + $0x44] ss:$16 sps:$4 sm:$0xff]   ;;  %v1907_v22 = vld [vmem:[#allocation8 + $0x4c] ss:$16 sps:$4 sm:$0xff]  }
  0x57   :  { %375 = vmatprep.subr.bf16.mxu0 %v1887_v9  ;;  %418 = vmatprep.subr.bf16.mxu1 %v1889_v10  ;;  %v1909_v23 = vld [vmem:[#allocation8 + $0x40] ss:$16 sps:$4 sm:$0xff]   ;;  %v1910_v24 = vld [vmem:[#allocation8 + $0x48] ss:$16 sps:$4 sm:$0xff]   ;;  %v1911_v25 = vld [vmem:[#allocation8 + $0x24] ss:$16 sps:$4 sm:$0xff]  }
  0x58   :  { %v1913_v26 = vld [vmem:[#allocation8 + $0x2c] ss:$16 sps:$4 sm:$0xff]   ;;  %v113_v28 = vld [vmem:[#allocation2 + $0x8] sm:$0xff]  ;;  %v1915_v30 = vld [vmem:[#allocation8 + $0x20] ss:$16 sps:$4 sm:$0xff]   ;;  %v2320_v58 = vshrl.u32 %v140_v55, 7 }
  0x59   :  { %v114_v29 = vadd.f32 %v113_v28, %v112_v27  ;;  %v1916_v31 = vld [vmem:[#allocation8 + $0x28] ss:$16 sps:$4 sm:$0xff]   ;;  %v1917_v32 = vld [vmem:[#allocation8 + $0x4] ss:$16 sps:$4 sm:$0xff]   ;;  %v1919_v34 = vld [vmem:[#allocation8 + $0xc] ss:$16 sps:$4 sm:$0xff]  }
  0x5a   :  { %376 = vmatpush1.bf16.msra.mxu0 %v1891_v11  ;;  %419 = vmatpush1.bf16.msra.mxu1 %v1892_v12  ;;  %v1921_v36 = vld [vmem:[#allocation8] ss:$16 sps:$4 sm:$0xff]   ;;  %v1922_v37 = vld [vmem:[#allocation8 + $0x8] ss:$16 sps:$4 sm:$0xff]   ;;  %v2323_v60 = vsub.s32 0, %v2320_v58  ;;  %vm2247_vm0 = vmmov 0  }
  0x5b   :  { %377 = vmatprep.subr.bf16.mxu0 %v1893_v13  ;;  %420 = vmatprep.subr.bf16.mxu1 %v1895_v14  ;;  %v115_v33 = vrot.slane %v114_v29, 4  ;;  %v1925_v39 = vld [vmem:[#allocation10 + $0xac] ss:$12 sps:$4 sm:$0xff]   ;;  %v135_v61 = vld [vmem:[#allocation5] sm:$0x1]  ;;  %s2248_s27 = smov [#allocation13]  }
  0x5c   :  { %v1928_v40 = vld [vmem:[#allocation10 + $0x22c] ss:$12 sps:$4 sm:$0xff]   ;;  %v1608_v0 = vld [vmem:[#allocation7] ss:$0 sm:$0xff]  ;;  %v1923_v4 = vld [vmem:[#allocation10 + $0xa8] ss:$12 sps:$4 sm:$0xff]  }
  0x5d   :  { %v116_v35 = vadd.f32 %v115_v33, %v114_v29  ;;  %v1926_v5 = vld [vmem:[#allocation10 + $0x228] ss:$12 sps:$4 sm:$0xff]   ;;  %v1929_v11 = vld [vmem:[#allocation10 + $0x90] ss:$12 sps:$4 sm:$0xff]   ;;  %s1593_s3 = sshll.u32 %s2248_s27, 4  ;;  %s1594_s3 = int_to_ptr.vmem [resolvable:$true] %s1593_s3 }
  0x5e   :  { %378 = vmatpush1.bf16.msra.mxu0 %v1897_v15  ;;  %421 = vmatpush1.bf16.msra.mxu1 %v1898_v16  ;;  %v1931_v8 = vld [vmem:[#allocation10 + $0x94] ss:$12 sps:$4 sm:$0xff]   ;;  %v1932_v12 = vld [vmem:[#allocation10 + $0x210] ss:$12 sps:$4 sm:$0xff]   ;;  %v1935_v15 = vld [vmem:[#allocation10 + $0x78] ss:$12 sps:$4 sm:$0xff]   ;;  %p2206_p3 = scmp.lt.s32.totalorder %s1594_s3, %s1594_s3 }
  0x5f   :  { %379 = vmatprep.subr.bf16.mxu0 %v1899_v17  ;;  %422 = vmatprep.subr.bf16.mxu1 %v1901_v18  ;;  %v117_v38 = vrot.slane %v116_v35, 2  ;;  %v1934_v9 = vld [vmem:[#allocation10 + $0x214] ss:$12 sps:$4 sm:$0xff]   ;;  %v1937_v13 = vld [vmem:[#allocation10 + $0x7c] ss:$12 sps:$4 sm:$0xff]   ;;  %s2201_s28 = scalar_lea.vmem %s1594_s3, 256 }
  0x60   :  { %v1940_v14 = vld [vmem:[#allocation10 + $0x1fc] ss:$12 sps:$4 sm:$0xff]   ;;  %v1938_v16 = vld [vmem:[#allocation10 + $0x1f8] ss:$12 sps:$4 sm:$0xff]   ;;  %p2202_p2 = scmp.ne.s32.totalorder %s1594_s3, %s2201_s28  ;;  %p2207_p4 = scmp.lt.s32.totalorder %s2201_s28, %s2201_s28 }
  0x61   :  { %v118_v41 = vadd.f32 %v117_v38, %v116_v35  ;;  %v1943_v17 = vld [vmem:[#allocation10 + $0x64] ss:$12 sps:$4 sm:$0xff]   ;;  %v1961_v29 = vld [vmem:[#allocation10 + $0x1c] ss:$12 sps:$4 sm:$0xff]   ;;  %v1965_v35 = vld [vmem:[#allocation10] ss:$12 sps:$4 sm:$0xff]  }
  0x62   :  { %380 = vmatpush1.bf16.msra.mxu0 %v1903_v19  ;;  %423 = vmatpush1.bf16.msra.mxu1 %v1904_v20  ;;  %v1946_v18 = vld [vmem:[#allocation10 + $0x1e4] ss:$12 sps:$4 sm:$0xff]   ;;  %v1941_v19 = vld [vmem:[#allocation10 + $0x60] ss:$12 sps:$4 sm:$0xff]   ;;  %v1995_v55 = vld [vmem:[#allocation10 + $0x108] ss:$12 sps:$4 sm:$0xff]   ;;  %p2208_p5 = por %p2207_p4, %p2206_p3 }
  0x63   :  { %381 = vmatprep.subr.bf16.mxu0 %v1905_v21  ;;  %424 = vmatprep.subr.bf16.mxu1 %v1907_v22  ;;  %v119_v42 = vrot.slane %v118_v41, 1  ;;  %v1944_v20 = vld [vmem:[#allocation10 + $0x1e0] ss:$12 sps:$4 sm:$0xff]   ;;  %v1967_v33 = vld [vmem:[#allocation10 + $0x4] ss:$12 sps:$4 sm:$0xff]  }
  0x64   :  { %v1949_v21 = vld [vmem:[#allocation10 + $0x4c] ss:$12 sps:$4 sm:$0xff]   ;;  %p2209_p6 = pnand %p2208_p5, %p2202_p2 }
  0x65   :  { %v120_v43 = vadd.f32 %v119_v42, %v118_v41  ;;  %v1952_v22 = vld [vmem:[#allocation10 + $0x1cc] ss:$12 sps:$4 sm:$0xff]   ;;  %v1979_v41 = vld [vmem:[#allocation10 + $0x154] ss:$12 sps:$4 sm:$0xff]  }
  0x66   :  { %382 = vmatpush1.bf16.msra.mxu0 %v1909_v23  ;;  %425 = vmatpush1.bf16.msra.mxu1 %v1910_v24  ;;  %v1947_v23 = vld [vmem:[#allocation10 + $0x48] ss:$12 sps:$4 sm:$0xff]   ;;  %v1976_v38 = vld [vmem:[#allocation10 + $0x2ec] ss:$12 sps:$4 sm:$0xff]  }
  0x67   :  { %383 = vmatprep.subr.bf16.mxu0 %v1911_v25  ;;  %426 = vmatprep.subr.bf16.mxu1 %v1913_v26  ;;  %v122_v44 = vmul.f32 0.0625, %v120_v43  ;;  %v1950_v24 = vld [vmem:[#allocation10 + $0x1c8] ss:$12 sps:$4 sm:$0xff]   ;;  %v1977_v43 = vld [vmem:[#allocation10 + $0x150] ss:$12 sps:$4 sm:$0xff]  }
  0x68   :  { %v1955_v25 = vld [vmem:[#allocation10 + $0x34] ss:$12 sps:$4 sm:$0xff]  }
  0x69   :  { %v123_v45 = vsub.f32 %v112_v27, %v122_v44  ;;  %v124_v46 = vsub.f32 %v113_v28, %v122_v44  ;;  %v1958_v26 = vld [vmem:[#allocation10 + $0x1b4] ss:$12 sps:$4 sm:$0xff]   ;;  %v1953_v27 = vld [vmem:[#allocation10 + $0x30] ss:$12 sps:$4 sm:$0xff]  }
  0x6a   :  { %384 = vmatpush1.bf16.msra.mxu0 %v1915_v30  ;;  %427 = vmatpush1.bf16.msra.mxu1 %v1916_v31  ;;  %v1956_v28 = vld [vmem:[#allocation10 + $0x1b0] ss:$12 sps:$4 sm:$0xff]   ;;  %v1959_v31 = vld [vmem:[#allocation10 + $0x18] ss:$12 sps:$4 sm:$0xff]   ;;  %v1982_v42 = vld [vmem:[#allocation10 + $0x2d4] ss:$12 sps:$4 sm:$0xff]  }
  0x6b   :  { %385 = vmatprep.subr.bf16.mxu0 %v1917_v32  ;;  %428 = vmatprep.subr.bf16.mxu1 %v1919_v34  ;;  %v125_v47 = vmul.f32 %v123_v45, %v123_v45  ;;  %v126_v48 = vmul.f32 %v124_v46, %v124_v46  ;;  %v1964_v30 = vld [vmem:[#allocation10 + $0x19c] ss:$12 sps:$4 sm:$0xff]   ;;  %v1962_v32 = vld [vmem:[#allocation10 + $0x198] ss:$12 sps:$4 sm:$0xff]  }
  0x6c   :  { %v1970_v34 = vld [vmem:[#allocation10 + $0x184] ss:$12 sps:$4 sm:$0xff]  }
  0x6d   :  { %v127_v49 = vadd.f32 %v126_v48, %v125_v47  ;;  %v1980_v44 = vld [vmem:[#allocation10 + $0x2d0] ss:$12 sps:$4 sm:$0xff]   ;;  %v1983_v47 = vld [vmem:[#allocation10 + $0x138] ss:$12 sps:$4 sm:$0xff]  }
  0x6e   :  { %386 = vmatpush1.bf16.msra.mxu0 %v1921_v36  ;;  %429 = vmatpush1.bf16.msra.mxu1 %v1922_v37  ;;  %v1968_v36 = vld [vmem:[#allocation10 + $0x180] ss:$12 sps:$4 sm:$0xff]   ;;  %v1986_v48 = vld [vmem:[#allocation10 + $0x2b8] ss:$12 sps:$4 sm:$0xff]  }
  0x6f   :  { %1126 = vmatprep.subr.bf16.mxu0 %v1925_v39  ;;  %1169 = vmatprep.subr.bf16.mxu1 %v1928_v40  ;;  %v128_v50 = vrot.slane %v127_v49, 4  ;;  %v1973_v37 = vld [vmem:[#allocation10 + $0x16c] ss:$12 sps:$4 sm:$0xff]   ;;  %v1971_v39 = vld [vmem:[#allocation10 + $0x168] ss:$12 sps:$4 sm:$0xff]  }
  0x70   :  { %v1974_v40 = vld [vmem:[#allocation10 + $0x2e8] ss:$12 sps:$4 sm:$0xff]  }
  0x71   :  { %v129_v51 = vadd.f32 %v128_v50, %v127_v49  ;;  %v1991_v49 = vld [vmem:[#allocation10 + $0x124] ss:$12 sps:$4 sm:$0xff]  }
  0x72   :  { %v1994_v50 = vld [vmem:[#allocation10 + $0x2a4] ss:$12 sps:$4 sm:$0xff]  }
  0x73   :  { %v130_v52 = vrot.slane %v129_v51, 2 }
  0x75   :  { %v131_v53 = vadd.f32 %v130_v52, %v129_v51  ;;  %v1989_v51 = vld [vmem:[#allocation10 + $0x120] ss:$12 sps:$4 sm:$0xff]  }
  0x76   :  { %v1992_v52 = vld [vmem:[#allocation10 + $0x2a0] ss:$12 sps:$4 sm:$0xff]  }
  0x77   :  { %v132_v54 = vrot.slane %v131_v53, 1 }
  0x79   :  { %v133_v56 = vadd.f32 %v132_v54, %v131_v53  ;;  %v1997_v53 = vld [vmem:[#allocation10 + $0x10c] ss:$12 sps:$4 sm:$0xff]  }
  0x7a   :  { %v2000_v54 = vld [vmem:[#allocation10 + $0x28c] ss:$12 sps:$4 sm:$0xff]  }
  0x7b   :  { %v134_v57 = vmul.f32 0.0625, %v133_v56  ;;  %v1998_v56 = vld [vmem:[#allocation10 + $0x288] ss:$12 sps:$4 sm:$0xff]  }
  0x7d   :  { %v136_v59 = vadd.f32 1e-05, %v134_v57  ;;  %v2003_v57 = vld [vmem:[#allocation10 + $0xf4] ss:$12 sps:$4 sm:$0xff]  }
  0x7f   :  { %2075 = vrsqrt.f32 %v136_v59  ;;  %v2006_v59 = vld [vmem:[#allocation10 + $0x274] ss:$12 sps:$4 sm:$0xff]  }
  0x8c   :  { %v2076_v62 = vpop.eup %2075 }
  0x8d   :  { %v138_v63 = vmul.f32 %v2076_v62, %v135_v61  ;;  %v2001_v61 = vld [vmem:[#allocation10 + $0xf0] ss:$12 sps:$4 sm:$0xff]  }
  0x8e   :  { %v2004_v62 = vld [vmem:[#allocation10 + $0x270] ss:$12 sps:$4 sm:$0xff]  }
  0x8f   :  { %v143_v1 = vrot.slane %v138_v63, %v2323_v60  ;;  %v2009_v63 = vld [vmem:[#allocation10 + $0xdc] ss:$12 sps:$4 sm:$0xff]  }
  0x91   :  { %v145_v2 = vmul.f32 %v143_v1, %v123_v45  ;;  %v146_v3 = vmul.f32 %v143_v1, %v124_v46  ;;  %v1985_v45 = vld [vmem:[#allocation10 + $0x13c] ss:$12 sps:$4 sm:$0xff]   ;;  %v2007_v1 = vld [vmem:[#allocation10 + $0xd8] ss:$12 sps:$4 sm:$0xff]  }
  0x92   :  { %v1988_v46 = vld [vmem:[#allocation10 + $0x2bc] ss:$12 sps:$4 sm:$0xff]  }
  0x93   :  { %v154_v6 = vadd.f32 %v1608_v0, %v145_v2  ;;  %v155_v7 = vadd.f32 %v1608_v0, %v146_v3  ;;  %v2012_v0 = vld [vmem:[#allocation10 + $0x25c] ss:$12 sps:$4 sm:$0xff]   ;;  %v2010_v2 = vld [vmem:[#allocation10 + $0x258] ss:$12 sps:$4 sm:$0xff]  }
  0x94   :  { %v2015_v3 = vld [vmem:[#allocation10 + $0xc4] ss:$12 sps:$4 sm:$0xff]  }
  0x95   :  { %v156_v10 = vpack.c.bf16 %v155_v7, %v154_v6  ;;  %v2016_v6 = vld [vmem:[#allocation10 + $0x240] ss:$12 sps:$4 sm:$0xff]   ;;  %v2019_v7 = vld [vmem:[#allocation10 + $0x170] ss:$12 sps:$4 sm:$0xff]  }
  0x97   :  { %404 = vmatmul.mubr.bf16.vlgmr.msra.gmra.mxu0 %v156_v10  ;;  %447 = vmatmul.mubr.bf16.vlgmr.msra.gmra.mxu1 %v156_v10  ;;  %v205_v10 = vsub.s32 3, %v2320_v58 }
  0x98   :  { %1127 = vmatpush1.bf16.msra.mxu0 %v1923_v4  ;;  %1170 = vmatpush1.bf16.msra.mxu1 %v1926_v5  ;;  %v2018_v4 = vld [vmem:[#allocation10 + $0x244] ss:$12 sps:$4 sm:$0xff]   ;;  %v2013_v5 = vld [vmem:[#allocation10 + $0xc0] ss:$12 sps:$4 sm:$0xff]  }
  0x99   :  { %1128 = vmatprep.subr.bf16.mxu0 %v1931_v8  ;;  %1171 = vmatprep.subr.bf16.mxu1 %v1934_v9  ;;  %v2020_v8 = vld [vmem:[#allocation10 + $0x2f0] ss:$12 sps:$4 sm:$0xff]   ;;  %v197_v9 = vsub.s32 1, %v2320_v58 }
  0x9c   :  { %1129 = vmatpush1.bf16.msra.mxu0 %v1929_v11  ;;  %1172 = vmatpush1.bf16.msra.mxu1 %v1932_v12  ;;  %v201_v11 = vsub.s32 2, %v2320_v58  ;;  %v189_v12 = vld [vmem:[%s2366_s4] sm:$0xf] }
  0x9d   :  { %1130 = vmatprep.subr.bf16.mxu0 %v1937_v13  ;;  %1173 = vmatprep.subr.bf16.mxu1 %v1940_v14 }
  0xa0   :  { %1131 = vmatpush1.bf16.msra.mxu0 %v1935_v15  ;;  %1174 = vmatpush1.bf16.msra.mxu1 %v1938_v16  ;;  %v198_v15 = vrot.slane %v189_v12, %v197_v9  ;;  %v206_v16 = vrot.slane %v189_v12, %v205_v10  ;;  %v2047_v10 = vld [vmem:[#allocation10 + $0xc8] ss:$12 sps:$4 sm:$0xff]  }
  0xa1   :  { %1132 = vmatprep.subr.bf16.mxu0 %v1943_v17  ;;  %1175 = vmatprep.subr.bf16.mxu1 %v1946_v18  ;;  %v194_v17 = vrot.slane %v189_v12, %v2323_v60  ;;  %v202_v18 = vrot.slane %v189_v12, %v201_v11  ;;  %v2048_v12 = vld [vmem:[#allocation10 + $0x248] ss:$12 sps:$4 sm:$0xff]  }
  0xa4   :  { %1133 = vmatpush1.bf16.msra.mxu0 %v1941_v19  ;;  %1176 = vmatpush1.bf16.msra.mxu1 %v1944_v20 }
  0xa5   :  { %1134 = vmatprep.subr.bf16.mxu0 %v1949_v21  ;;  %1177 = vmatprep.subr.bf16.mxu1 %v1952_v22 }
  0xa8   :  { %1135 = vmatpush1.bf16.msra.mxu0 %v1947_v23  ;;  %1178 = vmatpush1.bf16.msra.mxu1 %v1950_v24 }
  0xa9   :  { %1136 = vmatprep.subr.bf16.mxu0 %v1955_v25  ;;  %1179 = vmatprep.subr.bf16.mxu1 %v1958_v26 }
  0xac   :  { %1137 = vmatpush1.bf16.msra.mxu0 %v1953_v27  ;;  %1180 = vmatpush1.bf16.msra.mxu1 %v1956_v28 }
  0xad   :  { %1138 = vmatprep.subr.bf16.mxu0 %v1961_v29  ;;  %1181 = vmatprep.subr.bf16.mxu1 %v1964_v30 }
  0xb0   :  { %1139 = vmatpush1.bf16.msra.mxu0 %v1959_v31  ;;  %1182 = vmatpush1.bf16.msra.mxu1 %v1962_v32 }
  0xb1   :  { %1140 = vmatprep.subr.bf16.mxu0 %v1967_v33  ;;  %1183 = vmatprep.subr.bf16.mxu1 %v1970_v34 }
  0xb4   :  { %1141 = vmatpush1.bf16.msra.mxu0 %v1965_v35  ;;  %1184 = vmatpush1.bf16.msra.mxu1 %v1968_v36 }
  0xb5   :  { %1142 = vmatprep.subr.bf16.mxu0 %v1973_v37  ;;  %1185 = vmatprep.subr.bf16.mxu1 %v1976_v38 }
  0xb8   :  { %1143 = vmatpush2.bf16.msra.mxu0 %v1971_v39  ;;  %1186 = vmatpush2.bf16.msra.mxu1 %v1974_v40 }
  0xb9   :  { %1144 = vmatprep.subr.bf16.mxu0 %v1979_v41  ;;  %1187 = vmatprep.subr.bf16.mxu1 %v1982_v42 }
  0xbc   :  { %1145 = vmatpush2.bf16.msra.mxu0 %v1977_v43  ;;  %1188 = vmatpush2.bf16.msra.mxu1 %v1980_v44  ;;  %v2021_v43 = vld [vmem:[#allocation10 + $0xb0] ss:$12 sps:$4 sm:$0xff]  }
  0xbd   :  { %1146 = vmatprep.subr.bf16.mxu0 %v1985_v45  ;;  %1189 = vmatprep.subr.bf16.mxu1 %v1988_v46  ;;  %v2022_v44 = vld [vmem:[#allocation10 + $0x230] ss:$12 sps:$4 sm:$0xff]  }
  0xc0   :  { %1147 = vmatpush2.bf16.msra.mxu0 %v1983_v47  ;;  %1190 = vmatpush2.bf16.msra.mxu1 %v1986_v48  ;;  %v2023_v47 = vld [vmem:[#allocation10 + $0x158] ss:$12 sps:$4 sm:$0xff]  }
  0xc1   :  { %1148 = vmatprep.subr.bf16.mxu0 %v1991_v49  ;;  %1191 = vmatprep.subr.bf16.mxu1 %v1994_v50  ;;  %v2024_v48 = vld [vmem:[#allocation10 + $0x2d8] ss:$12 sps:$4 sm:$0xff]  }
  0xc2   :  { %v2025_v49 = vld [vmem:[#allocation10 + $0x98] ss:$12 sps:$4 sm:$0xff]  }
  0xc3   :  { %v2026_v50 = vld [vmem:[#allocation10 + $0x218] ss:$12 sps:$4 sm:$0xff]  }
  0xc4   :  { %1149 = vmatpush2.bf16.msra.mxu0 %v1989_v51  ;;  %1192 = vmatpush2.bf16.msra.mxu1 %v1992_v52  ;;  %v2027_v51 = vld [vmem:[#allocation10 + $0x140] ss:$12 sps:$4 sm:$0xff]  }
  0xc5   :  { %1150 = vmatprep.subr.bf16.mxu0 %v1997_v53  ;;  %1193 = vmatprep.subr.bf16.mxu1 %v2000_v54  ;;  %v2028_v52 = vld [vmem:[#allocation10 + $0x2c0] ss:$12 sps:$4 sm:$0xff]  }
  0xc6   :  { %v2029_v53 = vld [vmem:[#allocation10 + $0x80] ss:$12 sps:$4 sm:$0xff]  }
  0xc7   :  { %v2030_v54 = vld [vmem:[#allocation10 + $0x200] ss:$12 sps:$4 sm:$0xff]  }
  0xc8   :  { %1151 = vmatpush2.bf16.msra.mxu0 %v1995_v55  ;;  %1194 = vmatpush2.bf16.msra.mxu1 %v1998_v56  ;;  %v2031_v55 = vld [vmem:[#allocation10 + $0x128] ss:$12 sps:$4 sm:$0xff]  }
  0xc9   :  { %1152 = vmatprep.subr.bf16.mxu0 %v2003_v57  ;;  %1195 = vmatprep.subr.bf16.mxu1 %v2006_v59  ;;  %v2032_v56 = vld [vmem:[#allocation10 + $0x2a8] ss:$12 sps:$4 sm:$0xff]  }
  0xca   :  { %v2033_v57 = vld [vmem:[#allocation10 + $0x68] ss:$12 sps:$4 sm:$0xff]  }
  0xcb   :  { %v2034_v59 = vld [vmem:[#allocation10 + $0x1e8] ss:$12 sps:$4 sm:$0xff]  }
  0xcc   :  { %1153 = vmatpush2.bf16.msra.mxu0 %v2001_v61  ;;  %1196 = vmatpush2.bf16.msra.mxu1 %v2004_v62  ;;  %v2035_v61 = vld [vmem:[#allocation10 + $0x110] ss:$12 sps:$4 sm:$0xff]  }
  0xcd   :  { %1154 = vmatprep.subr.bf16.mxu0 %v2009_v63  ;;  %1197 = vmatprep.subr.bf16.mxu1 %v2012_v0  ;;  %v2036_v62 = vld [vmem:[#allocation10 + $0x290] ss:$12 sps:$4 sm:$0xff]  }
  0xce   :  { %v2037_v63 = vld [vmem:[#allocation10 + $0x50] ss:$12 sps:$4 sm:$0xff]  }
  0xcf   :  { %v2038_v0 = vld [vmem:[#allocation10 + $0x1d0] ss:$12 sps:$4 sm:$0xff]  }
  0xd0   :  { %1155 = vmatpush2.bf16.msra.mxu0 %v2007_v1  ;;  %1198 = vmatpush2.bf16.msra.mxu1 %v2010_v2  ;;  %v2039_v1 = vld [vmem:[#allocation10 + $0xf8] ss:$12 sps:$4 sm:$0xff]  }
  0xd1   :  { %1156 = vmatprep.subr.bf16.mxu0 %v2015_v3  ;;  %1199 = vmatprep.subr.bf16.mxu1 %v2018_v4  ;;  %v2040_v2 = vld [vmem:[#allocation10 + $0x278] ss:$12 sps:$4 sm:$0xff]  }
  0xd2   :  { %v2041_v3 = vld [vmem:[#allocation10 + $0x38] ss:$12 sps:$4 sm:$0xff]  }
  0xd3   :  { %v2042_v4 = vld [vmem:[#allocation10 + $0x1b8] ss:$12 sps:$4 sm:$0xff]  }
  0xd4   :  { %1157 = vmatpush2.bf16.msra.mxu0 %v2013_v5  ;;  %1200 = vmatpush2.bf16.msra.mxu1 %v2016_v6  ;;  %v2043_v5 = vld [vmem:[#allocation10 + $0xe0] ss:$12 sps:$4 sm:$0xff]  }
  0xd5   :  { %1762 = vmatprep.subr.bf16.mxu0 %v2019_v7  ;;  %1784 = vmatprep.subr.bf16.mxu1 %v2020_v8  ;;  %v2044_v6 = vld [vmem:[#allocation10 + $0x260] ss:$12 sps:$4 sm:$0xff]  }
  0xd6   :  { %v2045_v7 = vld [vmem:[#allocation10 + $0x20] ss:$12 sps:$4 sm:$0xff]  }
  0xd7   :  { %v2046_v8 = vld [vmem:[#allocation10 + $0x1a0] ss:$12 sps:$4 sm:$0xff]  }
 0x157   :  { %v405_v13 = vpop.f32.mrf.mxu0  ;;  %v448_v14 = vpop.f32.mrf.mxu1 }
 0x158   :  { %v406_v27 = vadd.f32 %v405_v13, %v194_v17  ;;  %v449_v28 = vadd.f32 %v448_v14, %v202_v18  ;;  %v2049_v13 = vld [vmem:[#allocation10 + $0x8] ss:$12 sps:$4 sm:$0xff]  }
 0x159   :  { %v407_v19 = vpop.f32.mrf.mxu0  ;;  %v450_v20 = vpop.f32.mrf.mxu1  ;;  %v2050_v14 = vld [vmem:[#allocation10 + $0x188] ss:$12 sps:$4 sm:$0xff]  }
 0x15a   :  { %v408_v23 = vadd.f32 %v407_v19, %v198_v15  ;;  %v451_v24 = vadd.f32 %v450_v20, %v206_v16  ;;  %v457_v39 = vmax.f32 %v406_v27, 0.0  ;;  %v459_v40 = vmax.f32 %v449_v28, 0.0  ;;  %v2055_v19 = vld [vmem:[#allocation11 + $0x68] sm:$0xff]  }
 0x15b   :  { %v409_v21 = vpop.f32.mrf.mxu0  ;;  %v452_v22 = vpop.f32.mrf.mxu1  ;;  %v2056_v20 = vld [vmem:[#allocation11 + $0x28] sm:$0xff]  }
 0x15c   :  { %v410_v25 = vadd.f32 %v409_v21, %v194_v17  ;;  %v453_v26 = vadd.f32 %v452_v22, %v202_v18  ;;  %v458_v35 = vmax.f32 %v408_v23, 0.0  ;;  %v460_v36 = vmax.f32 %v451_v24, 0.0  ;;  %v2053_v17 = vld [vmem:[#allocation11 + $0x70] sm:$0xff]   ;;  %v2057_v21 = vld [vmem:[#allocation11 + $0x60] sm:$0xff]   ;;  %v2059_v23 = vld [vmem:[#allocation11 + $0x58] sm:$0xff]  }
 0x15d   :  { %v411_v29 = vpop.f32.mrf.mxu0  ;;  %v454_v30 = vpop.f32.mrf.mxu1  ;;  %v2054_v18 = vld [vmem:[#allocation11 + $0x30] sm:$0xff]   ;;  %v2058_v22 = vld [vmem:[#allocation11 + $0x20] sm:$0xff]   ;;  %v2060_v24 = vld [vmem:[#allocation11 + $0x18] sm:$0xff]  }
 0x15e   :  { %v412_v31 = vadd.f32 %v411_v29, %v198_v15  ;;  %v455_v32 = vadd.f32 %v454_v30, %v206_v16  ;;  %v461_v33 = vmax.f32 %v410_v25, 0.0  ;;  %v463_v34 = vmax.f32 %v453_v26, 0.0  ;;  %v2051_v15 = vld [vmem:[#allocation11 + $0x78] sm:$0xff]   ;;  %v2061_v25 = vld [vmem:[#allocation11 + $0x50] sm:$0xff]   ;;  %v2063_v27 = vld [vmem:[#allocation11 + $0x48] sm:$0xff]  }
 0x15f   :  { %v2052_v16 = vld [vmem:[#allocation11 + $0x38] sm:$0xff]   ;;  %v2062_v26 = vld [vmem:[#allocation11 + $0x10] sm:$0xff]   ;;  %v2064_v28 = vld [vmem:[#allocation11 + $0x8] sm:$0xff]  }
 0x160   :  { %v462_v37 = vmax.f32 %v412_v31, 0.0  ;;  %v464_v38 = vmax.f32 %v455_v32, 0.0  ;;  %v2337_v45 = vpack.c.bf16 %v461_v33, %v457_v39  ;;  %v2339_v46 = vpack.c.bf16 %v463_v34, %v459_v40  ;;  %v2065_v29 = vld [vmem:[#allocation11 + $0x40] sm:$0xff]   ;;  %v2067_v31 = vld [vmem:[#allocation11 + $0xb8] sm:$0xff]   ;;  %v2068_v33 = vld [vmem:[#allocation11 + $0xb0] sm:$0xff]  }
 0x161   :  { %v2066_v30 = vld [vmem:[#allocation11] sm:$0xff]   ;;  %v2246_v32 = vmov 0.0   ;;  %v2069_v34 = vld [vmem:[#allocation11 + $0xa8] sm:$0xff]  }
 0x162   :  { %v466_v41 = vpack.c.bf16 %v462_v37, %v458_v35  ;;  %v468_v42 = vpack.c.bf16 %v464_v38, %v460_v36  ;;  %v2070_v35 = vld [vmem:[#allocation11 + $0xa0] sm:$0xff]   ;;  %v2071_v36 = vld [vmem:[#allocation11 + $0x98] sm:$0xff]   ;;  %v2072_v37 = vld [vmem:[#allocation11 + $0x90] sm:$0xff]  }
 0x163   :  { %v2073_v38 = vld [vmem:[#allocation11 + $0x88] sm:$0xff]   ;;  %v2074_v39 = vld [vmem:[#allocation11 + $0x80] sm:$0xff]  }
 0x164   :  { %1158 = vmatprep.mubr.bf16.mxu0 %v466_v41  ;;  %1201 = vmatprep.mubr.bf16.mxu1 %v468_v42  ;;  %v597_v40 = vld [vmem:[%s2368_s6] sm:$0x7] }
 0x165   :  { %1159 = vmatmul.mubr.bf16.vlgmr.msra.gmra.mxu0 %v2337_v45  ;;  %1202 = vmatmul.mubr.bf16.vlgmr.msra.gmra.mxu1 %v2339_v46 }
 0x166   :  { %1763 = vmatpush3.bf16.msra.mxu0 %v2021_v43  ;;  %1785 = vmatpush3.bf16.msra.mxu1 %v2022_v44 }
 0x167   :  { %1244 = vmatprep.mubr.bf16.mxu0 %v466_v41  ;;  %1285 = vmatprep.mubr.bf16.mxu1 %v468_v42  ;;  %v606_v41 = vrot.slane %v597_v40, %v197_v9  ;;  %v602_v42 = vrot.slane %v597_v40, %v2323_v60 }
 0x168   :  { %1764 = vmatprep.subr.bf16.mxu0 %v2023_v47  ;;  %1786 = vmatprep.subr.bf16.mxu1 %v2024_v48 }
 0x16a   :  { %1765 = vmatpush3.bf16.msra.mxu0 %v2025_v49  ;;  %1787 = vmatpush3.bf16.msra.mxu1 %v2026_v50 }
 0x16b   :  { %1766 = vmatprep.subr.bf16.mxu0 %v2027_v51  ;;  %1788 = vmatprep.subr.bf16.mxu1 %v2028_v52 }
 0x16e   :  { %1767 = vmatpush3.bf16.msra.mxu0 %v2029_v53  ;;  %1789 = vmatpush3.bf16.msra.mxu1 %v2030_v54 }
 0x16f   :  { %1768 = vmatprep.subr.bf16.mxu0 %v2031_v55  ;;  %1790 = vmatprep.subr.bf16.mxu1 %v2032_v56 }
 0x172   :  { %1769 = vmatpush3.bf16.msra.mxu0 %v2033_v57  ;;  %1791 = vmatpush3.bf16.msra.mxu1 %v2034_v59 }
 0x173   :  { %1770 = vmatprep.subr.bf16.mxu0 %v2035_v61  ;;  %1792 = vmatprep.subr.bf16.mxu1 %v2036_v62 }
 0x176   :  { %1771 = vmatpush3.bf16.msra.mxu0 %v2037_v63  ;;  %1793 = vmatpush3.bf16.msra.mxu1 %v2038_v0 }
 0x177   :  { %1772 = vmatprep.subr.bf16.mxu0 %v2039_v1  ;;  %1794 = vmatprep.subr.bf16.mxu1 %v2040_v2 }
 0x17a   :  { %1773 = vmatpush3.bf16.msra.mxu0 %v2041_v3  ;;  %1795 = vmatpush3.bf16.msra.mxu1 %v2042_v4  ;;  %v610_v3 = vrot.slane %v597_v40, %v201_v11 }
 0x17b   :  { %1774 = vmatprep.subr.bf16.mxu0 %v2043_v5  ;;  %1796 = vmatprep.subr.bf16.mxu1 %v2044_v6 }
 0x17e   :  { %1775 = vmatpush3.bf16.msra.mxu0 %v2045_v7  ;;  %1797 = vmatpush3.bf16.msra.mxu1 %v2046_v8 }
 0x17f   :  { %1776 = vmatprep.subr.bf16.mxu0 %v2047_v10  ;;  %1798 = vmatprep.subr.bf16.mxu1 %v2048_v12 }
 0x182   :  { %1777 = vmatpush3.bf16.msra.mxu0 %v2049_v13  ;;  %1799 = vmatpush3.bf16.msra.mxu1 %v2050_v14 }
 0x183   :  { %1806 = vmatprep.subr.bf16.mxu0 %v2051_v15  ;;  %1837 = vmatprep.subr.bf16.mxu1 %v2246_v32 }
 0x185   :  { %1245 = vmatmul.mubr.bf16.vlgmr.msra.gmra.mxu0 %v2337_v45  ;;  %1286 = vmatmul.mubr.bf16.vlgmr.msra.gmra.mxu1 %v2339_v46 }
 0x186   :  { %1807 = vmatpush3.bf16.msra.mxu0 %v2052_v16  ;;  %1838 = vmatpush3.bf16.msra.mxu1 %v2067_v31 }
 0x187   :  { %1808 = vmatprep.subr.bf16.mxu0 %v2053_v17  ;;  %1839 = vmatprep.subr.bf16.mxu1 %v2246_v32 }
 0x188   :  { %1853 = vmatprep.mubr.msk.bf16.mxu1 %vm2247_vm0, %v2246_v32 }
 0x18a   :  { %1809 = vmatpush3.bf16.msra.mxu0 %v2054_v18  ;;  %1840 = vmatpush3.bf16.msra.mxu1 %v2068_v33 }
 0x18b   :  { %1810 = vmatprep.subr.bf16.mxu0 %v2055_v19  ;;  %1841 = vmatprep.subr.bf16.mxu1 %v2246_v32 }
 0x18e   :  { %1811 = vmatpush3.bf16.msra.mxu0 %v2056_v20  ;;  %1842 = vmatpush3.bf16.msra.mxu1 %v2069_v34 }
 0x18f   :  { %1812 = vmatprep.subr.bf16.mxu0 %v2057_v21  ;;  %1843 = vmatprep.subr.bf16.mxu1 %v2246_v32 }
 0x192   :  { %1813 = vmatpush3.bf16.msra.mxu0 %v2058_v22  ;;  %1844 = vmatpush3.bf16.msra.mxu1 %v2070_v35 }
 0x193   :  { %1814 = vmatprep.subr.bf16.mxu0 %v2059_v23  ;;  %1845 = vmatprep.subr.bf16.mxu1 %v2246_v32 }
 0x196   :  { %1815 = vmatpush3.bf16.msra.mxu0 %v2060_v24  ;;  %1846 = vmatpush3.bf16.msra.mxu1 %v2071_v36 }
 0x197   :  { %1816 = vmatprep.subr.bf16.mxu0 %v2061_v25  ;;  %1847 = vmatprep.subr.bf16.mxu1 %v2246_v32 }
 0x19a   :  { %1817 = vmatpush3.bf16.msra.mxu0 %v2062_v26  ;;  %1848 = vmatpush3.bf16.msra.mxu1 %v2072_v37  ;;  %v1737_v26 = vld [vmem:[%s2370_s8] ss:$0 sm:$0xff] }
 0x19b   :  { %1818 = vmatprep.subr.bf16.mxu0 %v2063_v27  ;;  %1849 = vmatprep.subr.bf16.mxu1 %v2246_v32 }
 0x19e   :  { %1819 = vmatpush3.bf16.msra.mxu0 %v2064_v28  ;;  %1850 = vmatpush3.bf16.msra.mxu1 %v2073_v38 }
 0x19f   :  { %1820 = vmatprep.subr.bf16.mxu0 %v2065_v29  ;;  %1851 = vmatprep.subr.bf16.mxu1 %v2246_v32 }
 0x1a2   :  { %1821 = vmatpush3.bf16.msra.mxu0 %v2066_v30  ;;  %1852 = vmatpush3.bf16.msra.mxu1 %v2074_v39 }
 0x225   :  { %v1160_v43 = vpop.f32.mrf.mxu0  ;;  %v1203_v44 = vpop.f32.mrf.mxu1 }
 0x226   :  { %v1161_v48 = vadd.f32 %v1160_v43, %v602_v42 }
 0x227   :  { %v1162_v45 = vpop.f32.mrf.mxu0  ;;  %v1205_v46 = vpop.f32.mrf.mxu1 }
 0x228   :  { %v1163_v47 = vadd.f32 %v1162_v45, %v606_v41  ;;  %v1204_v56 = vadd.f32 %v1203_v44, %v1161_v48 }
 0x229   :  { %v1164_v49 = vpop.f32.mrf.mxu0  ;;  %v1207_v50 = vpop.f32.mrf.mxu1 }
 0x22a   :  { %v1165_v51 = vadd.f32 %v1164_v49, %v602_v42  ;;  %v1206_v53 = vadd.f32 %v1205_v46, %v1163_v47  ;;  %v1294_v60 = vmax.f32 %v1204_v56, 0.0 }
 0x22b   :  { %v1166_v52 = vpop.f32.mrf.mxu0  ;;  %v1209_v57 = vpop.f32.mrf.mxu1 }
 0x22c   :  { %v1208_v54 = vadd.f32 %v1207_v50, %v1165_v51  ;;  %v1167_v55 = vadd.f32 %v1166_v52, %v606_v41  ;;  %v1295_v9 = vmax.f32 %v1206_v53, 0.0 }
 0x22e   :  { %v1210_v59 = vadd.f32 %v1209_v57, %v1167_v55  ;;  %v1297_v61 = vmax.f32 %v1208_v54, 0.0 }
 0x230   :  { %v1298_v62 = vmax.f32 %v1210_v59, 0.0  ;;  %v1300_v0 = vpack.c.bf16 %v1297_v61, %v1294_v60 }
 0x232   :  { %v1301_v63 = vpack.c.bf16 %v1298_v62, %v1295_v9 }
 0x234   :  { %1534 = vmatprep.mubr.bf16.mxu0 %v1301_v63 }
 0x235   :  { %1535 = vmatmul.mubr.bf16.vlgmr.msra.gmra.mxu0 %v1300_v0 }
 0x245   :  { %v1778_v1 = vpop.f32.mrf.mxu0  ;;  %v1800_v2 = vpop.f32.mrf.mxu1 }
 0x247   :  { %v1779_v4 = vpop.f32.mrf.mxu0  ;;  %v1801_v5 = vpop.f32.mrf.mxu1 }
 0x248   :  { %v1780_v6 = vadd.f32 %v1779_v4, %v1778_v1  ;;  %v1802_v14 = vadd.f32 %v1801_v5, %v1800_v2 }
 0x249   :  { %v1781_v7 = vpop.f32.mrf.mxu0  ;;  %v1803_v8 = vpop.f32.mrf.mxu1 }
 0x24a   :  { %v1247_v10 = vadd.f32 %v1780_v6, %v610_v3 }
 0x24b   :  { %v1782_v12 = vpop.f32.mrf.mxu0  ;;  %v1804_v13 = vpop.f32.mrf.mxu1 }
 0x24c   :  { %v1783_v15 = vadd.f32 %v1782_v12, %v1781_v7  ;;  %v1288_v16 = vadd.f32 %v1802_v14, %v1247_v10  ;;  %v1805_v18 = vadd.f32 %v1804_v13, %v1803_v8 }
 0x24e   :  { %v1250_v17 = vadd.f32 %v1783_v15, %v610_v3  ;;  %v1296_v20 = vmax.f32 %v1288_v16, 0.0 }
 0x250   :  { %v1291_v19 = vadd.f32 %v1805_v18, %v1250_v17 }
 0x252   :  { %v1299_v21 = vmax.f32 %v1291_v19, 0.0 }
 0x254   :  { %v1302_v22 = vpack.c.bf16 %v1299_v21, %v1296_v20 }
 0x256   :  { %1854 = vmatmul.mubr.bf16.vlgmr.msra.gmra.mxu1 %v1302_v22 }
 0x2f5   :  { %v1822_v58 = vpop.f32.mrf.mxu0 }
 0x2f7   :  { %v1823_v11 = vpop.f32.mrf.mxu0 }
 0x2f8   :  { %v1824_v24 = vadd.f32 %v1823_v11, %v1822_v58 }
 0x2f9   :  { %v1825_v23 = vpop.f32.mrf.mxu0 }
 0x2fa   :  { %v1537_v28 = vadd.f32 %v1824_v24, %v1737_v26 }
 0x2fb   :  { %v1826_v25 = vpop.f32.mrf.mxu0 }
 0x2fc   :  { %v1827_v27 = vadd.f32 %v1826_v25, %v1825_v23 }
 0x2fe   :  { %v1540_v32 = vadd.f32 %v1827_v27, %v1737_v26 }
 0x316   :  { %v1577_v29 = vpop.f32.mrf.mxu1 }
 0x317   :  { %v1578_v30 = vadd.f32 %v1577_v29, %v1537_v28 }
 0x318   :  { %v1855_v31 = vpop.f32.mrf.mxu1 }
 0x319   :  { %2077 = vtanh.f32 %v1578_v30 }
 0x31a   :  { %v1580_v33 = vpop.f32.mrf.mxu1 }
 0x31b   :  { %v1581_v34 = vadd.f32 %v1580_v33, %v1540_v32 }
 0x31c   :  { %v1856_v35 = vpop.f32.mrf.mxu1 }
 0x31d   :  { %2079 = vtanh.f32 %v1581_v34 }
 0x326   :  { %v2078_v36 = vpop.eup %2077 }
 0x327   :  { %1586 = vst [vmem:[#allocation13] sm:$0xff] %v2078_v36 }
 0x32a   :  { %v2080_v37 = vpop.eup %2079 }
 0x32b   :  { %1587 = vst [vmem:[#allocation13 + $0x8] sm:$0xff] %v2080_v37 }
 0x32c   :  { %2212 = shalt.err (!%p2209_p6)
}
 0x32d   :  { %1599 = dma.vmem_to_hbm [thread:$0]  %s1594_s3, 256, %s2371_s9, [#allocation4], %s2236_s1, %s2236_s1, %s2237_s25  }
 0x32e   :  { %2229 = dma.done.wait [#allocation4], 256  }
 0x32f   :  { %2230 = vsyncadd [#allocation4], 4294967040 }
 0x330   :  { %1603 = vsyncpa [#allocation3], 1 }
 0x331   :  { %1604 = vsyncpa [#allocation6], 1 }
 0x332   :  { %1605 = vsyncpa [#allocation9], 1 }
 0x333   :  { %1606 = vsyncpa [#allocation12], 1 }
 0x334   :  { %1607 = vsyncpa [#allocation4], 1 }

</bundles_post_ra>
